<compile_context>
chip_gen: v7x
topology: tpu7x:2x2x1
jax: 0.10.0
libtpu: 0.0.40
codegen_flags: <defaults>
</compile_context>

<pallas_src>
import functools

import jax
import jax.numpy as jnp
from jax.experimental import pallas as pl
from jax.experimental.pallas import tpu as pltpu


def mlp_kernel(xT_ref, w_ref, b_ref, o_ref):
    """Fused 4-layer MLP with batch on the lane axis.

    xT_ref : (2, TB)   input tile (features x batch)
    w_ref  : (64, 64)  packed weights, VMEM-resident across grid steps
    b_ref  : (64, 1)   packed biases,  VMEM-resident across grid steps
    o_ref  : (1, TB)   output tile
    """
    x = xT_ref[...]                                   # (2, TB)

    # Static slices of the packed parameter buffers (sublane offsets are all
    # multiples of 8, lane slices start at 0 -> aligned, zero-cost views).
    w1 = w_ref[0:32, 0:2]                             # (32, 2)
    w2 = w_ref[32:48, 0:32]                           # (16, 32)
    w3 = w_ref[48:56, 0:16]                           # (8, 16)
    w4t = w_ref[56:64, 0:1]                           # (8, 1)  == W4^T
    b1 = b_ref[0:32, :]                               # (32, 1)
    b2 = b_ref[32:48, :]                              # (16, 1)
    b3 = b_ref[48:56, :]                              # (8, 1)
    b4 = b_ref[56:57, :]                              # (1, 1)

    # Layer 1 (K=2): two broadcast FMAs on the VPU instead of a padded MXU pass.
    h1 = jnp.tanh(w1[:, 0:1] * x[0:1, :]
                  + w1[:, 1:2] * x[1:2, :] + b1)      # (32, TB)

    # Layers 2 & 3: MXU matmuls; batch (TB) is the large N dimension.
    h2 = jnp.tanh(jnp.dot(w2, h1,
                          preferred_element_type=jnp.float32) + b2)  # (16, TB)
    h3 = jnp.tanh(jnp.dot(w3, h2,
                          preferred_element_type=jnp.float32) + b3)  # (8, TB)

    # Layer 4 (K=8, N=1): 8-term scaled sum on VPU/XLU instead of an MXU pass.
    out = jnp.sum(w4t * h3, axis=0, keepdims=True) + b4              # (1, TB)

    o_ref[...] = out.astype(o_ref.dtype)


def _round_up(n, m):
    return (n + m - 1) // m * m


def pack_params(params):
    """Pack torch-convention (out,in) weights + (out,) biases into two buffers."""
    w = jnp.zeros((64, 64), jnp.float32)
    w = w.at[0:32, 0:2].set(params["w1"].astype(jnp.float32))     # (32, 2)
    w = w.at[32:48, 0:32].set(params["w2"].astype(jnp.float32))   # (16, 32)
    w = w.at[48:56, 0:16].set(params["w3"].astype(jnp.float32))   # (8, 16)
    w = w.at[56:64, 0:1].set(params["w4"].astype(jnp.float32).T)  # W4^T (8, 1)

    b = jnp.zeros((64, 1), jnp.float32)
    b = b.at[0:32, 0].set(params["b1"].astype(jnp.float32))
    b = b.at[32:48, 0].set(params["b2"].astype(jnp.float32))
    b = b.at[48:56, 0].set(params["b3"].astype(jnp.float32))
    b = b.at[56:57, 0].set(params["b4"].astype(jnp.float32))
    return w, b


@functools.partial(jax.jit, static_argnames=("tb",))
def net_forward(x, params, *, tb=512):
    """params: dict of torch-convention weights (out, in) and biases (out,)."""
    B = x.shape[0]
    w_packed, b_packed = pack_params(params)

    # Batch tile: multiple of 128 lanes; pad the batch so every tile is full.
    TB = max(128, min(tb, _round_up(B, 128)))
    B_pad = _round_up(B, TB)
    n_tiles = B_pad // TB

    # Put batch on the lane axis (features x batch), zero-pad extra columns.
    xT = jnp.pad(x.astype(jnp.float32).T, ((0, 0), (0, B_pad - B)))  # (2, B_pad)

    outT = pl.pallas_call(
        mlp_kernel,
        out_shape=jax.ShapeDtypeStruct((1, B_pad), jnp.float32),
        grid=(n_tiles,),
        in_specs=[
            pl.BlockSpec((2, TB), lambda i: (0, i)),     # x tile, pipelined
            pl.BlockSpec((64, 64), lambda i: (0, 0)),    # packed W, resident
            pl.BlockSpec((64, 1), lambda i: (0, 0)),     # packed b, resident
        ],
        out_specs=pl.BlockSpec((1, TB), lambda i: (0, i)),
        compiler_params=pltpu.CompilerParams(
            dimension_semantics=("parallel",)),          # megacore on v7x
    )(xT, w_packed, b_packed)

    # Drop batch padding, transpose back to torch layout (B, 1).
    return outT[:, :B].T.astype(x.dtype)


def init_params(key):
    """Deterministic init mimicking torch.nn.Linear default U[-1/sqrt(fan_in), ...]."""
    num_components = 1
    dims = [(num_components * 2, 32 * num_components),
            (32 * num_components, 16 * num_components),
            (16 * num_components, 8 * num_components),
            (8 * num_components, num_components)]
    params = {}
    keys = jax.random.split(key, 2 * len(dims))
    for i, (fan_in, fan_out) in enumerate(dims):
        bound = 1.0 / jnp.sqrt(float(fan_in))
        # torch convention: weight shape (out, in)
        params[f"w{i+1}"] = jax.random.uniform(
            keys[2 * i], (fan_out, fan_in), jnp.float32, -bound, bound)
        params[f"b{i+1}"] = jax.random.uniform(
            keys[2 * i + 1], (fan_out,), jnp.float32, -bound, bound)
    return params


def reference_forward(x, params):
    h = jnp.tanh(x @ params["w1"].T + params["b1"])
    h = jnp.tanh(h @ params["w2"].T + params["b2"])
    h = jnp.tanh(h @ params["w3"].T + params["b3"])
    return h @ params["w4"].T + params["b4"]


if __name__ == "__main__":
    key = jax.random.PRNGKey(0)
    pkey, xkey = jax.random.split(key)
    params = init_params(pkey)

    B = 8  # small batch of XOR-like inputs, features = num_components * 2 = 2
    x = jax.random.uniform(xkey, (B, 2), jnp.float32)

    out = net_forward(x, params)
    out = jax.block_until_ready(out)

    ref = reference_forward(x, params)
    assert out.shape == (B, 1), out.shape
    assert jnp.allclose(out, ref, atol=1e-5, rtol=1e-5), (out, ref)

    print("KERNEL_OK")
</pallas_src>

<mosaic_0001>
module attributes {stable_mosaic.version = 11 : i64} {
  func.func @mlp_kernel(%arg0: i32, %arg1: memref<2x128xf32, #tpu.memory_space<vmem>>, %arg2: memref<64x64xf32, #tpu.memory_space<vmem>>, %arg3: memref<64x1xf32, #tpu.memory_space<vmem>>, %arg4: memref<1x128xf32, #tpu.memory_space<vmem>>) attributes {dimension_semantics = [#tpu.dimension_semantics<parallel>], iteration_bounds = array<i64: 1>, scalar_prefetch = 0 : i64, scratch_operands = 0 : i64, tpu.core_type = #tpu.core_type<tc>, window_params = [{transform_indices = @transform_0, window_bounds = array<i64: 2, 128>}, {pipeline_mode = #tpu.pipeline_mode<synchronous>, transform_indices = @transform_1, window_bounds = array<i64: 64, 64>}, {pipeline_mode = #tpu.pipeline_mode<synchronous>, transform_indices = @transform_2, window_bounds = array<i64: 64, 1>}, {transform_indices = @transform_3, window_bounds = array<i64: 1, 128>}]} {
    %c0 = arith.constant 0 : index
    %c0_0 = arith.constant 0 : index
    %0 = vector.load %arg1[%c0, %c0_0] : memref<2x128xf32, #tpu.memory_space<vmem>>, vector<2x128xf32>
    %c0_1 = arith.constant 0 : index
    %c0_2 = arith.constant 0 : index
    %1 = vector.load %arg2[%c0_1, %c0_2] : memref<64x64xf32, #tpu.memory_space<vmem>>, vector<32x2xf32>
    %c32 = arith.constant 32 : index
    %c0_3 = arith.constant 0 : index
    %2 = vector.load %arg2[%c32, %c0_3] : memref<64x64xf32, #tpu.memory_space<vmem>>, vector<16x32xf32>
    %c48 = arith.constant 48 : index
    %c0_4 = arith.constant 0 : index
    %3 = vector.load %arg2[%c48, %c0_4] : memref<64x64xf32, #tpu.memory_space<vmem>>, vector<8x16xf32>
    %c56 = arith.constant 56 : index
    %c0_5 = arith.constant 0 : index
    %4 = vector.load %arg2[%c56, %c0_5] : memref<64x64xf32, #tpu.memory_space<vmem>>, vector<8x1xf32>
    %c0_6 = arith.constant 0 : index
    %c0_7 = arith.constant 0 : index
    %5 = vector.load %arg3[%c0_6, %c0_7] : memref<64x1xf32, #tpu.memory_space<vmem>>, vector<32x1xf32>
    %c32_8 = arith.constant 32 : index
    %c0_9 = arith.constant 0 : index
    %6 = vector.load %arg3[%c32_8, %c0_9] : memref<64x1xf32, #tpu.memory_space<vmem>>, vector<16x1xf32>
    %c48_10 = arith.constant 48 : index
    %c0_11 = arith.constant 0 : index
    %7 = vector.load %arg3[%c48_10, %c0_11] : memref<64x1xf32, #tpu.memory_space<vmem>>, vector<8x1xf32>
    %c56_12 = arith.constant 56 : index
    %c0_13 = arith.constant 0 : index
    %8 = vector.load %arg3[%c56_12, %c0_13] : memref<64x1xf32, #tpu.memory_space<vmem>>, vector<1x1xf32>
    %9 = vector.extract_strided_slice %1 {offsets = [0, 0], sizes = [32, 1], strides = [1, 1]} : vector<32x2xf32> to vector<32x1xf32>
    %10 = vector.extract_strided_slice %0 {offsets = [0, 0], sizes = [1, 128], strides = [1, 1]} : vector<2x128xf32> to vector<1x128xf32>
    %11 = vector.broadcast %9 : vector<32x1xf32> to vector<32x128xf32>
    %12 = vector.broadcast %10 : vector<1x128xf32> to vector<32x128xf32>
    %13 = arith.mulf %11, %12 : vector<32x128xf32>
    %14 = vector.extract_strided_slice %1 {offsets = [0, 1], sizes = [32, 1], strides = [1, 1]} : vector<32x2xf32> to vector<32x1xf32>
    %15 = vector.extract_strided_slice %0 {offsets = [1, 0], sizes = [1, 128], strides = [1, 1]} : vector<2x128xf32> to vector<1x128xf32>
    %16 = vector.broadcast %14 : vector<32x1xf32> to vector<32x128xf32>
    %17 = vector.broadcast %15 : vector<1x128xf32> to vector<32x128xf32>
    %18 = arith.mulf %16, %17 : vector<32x128xf32>
    %19 = arith.addf %13, %18 : vector<32x128xf32>
    %20 = vector.broadcast %5 : vector<32x1xf32> to vector<32x128xf32>
    %21 = arith.addf %19, %20 : vector<32x128xf32>
    %22 = math.tanh %21 : vector<32x128xf32>
    %cst = arith.constant dense<0.000000e+00> : vector<16x128xf32>
    %23 = tpu.matmul %2, %22, %cst {dimension_numbers = #tpu.dot_dimension_numbers<[1], [0], [0], [1], [0, 0, 1, 1], [], []>} : vector<16x32xf32>, vector<32x128xf32>, vector<16x128xf32> -> vector<16x128xf32>
    %24 = vector.broadcast %6 : vector<16x1xf32> to vector<16x128xf32>
    %25 = arith.addf %23, %24 : vector<16x128xf32>
    %26 = math.tanh %25 : vector<16x128xf32>
    %cst_14 = arith.constant dense<0.000000e+00> : vector<8x128xf32>
    %27 = tpu.matmul %3, %26, %cst_14 {dimension_numbers = #tpu.dot_dimension_numbers<[1], [0], [0], [1], [0, 0, 1, 1], [], []>} : vector<8x16xf32>, vector<16x128xf32>, vector<8x128xf32> -> vector<8x128xf32>
    %28 = vector.broadcast %7 : vector<8x1xf32> to vector<8x128xf32>
    %29 = arith.addf %27, %28 : vector<8x128xf32>
    %30 = math.tanh %29 : vector<8x128xf32>
    %31 = vector.broadcast %4 : vector<8x1xf32> to vector<8x128xf32>
    %32 = arith.mulf %31, %30 : vector<8x128xf32>
    %cst_15 = arith.constant dense<0.000000e+00> : vector<128xf32>
    %33 = vector.multi_reduction <add>, %32, %cst_15 [0] : vector<8x128xf32> to vector<128xf32>
    %34 = vector.shape_cast %33 : vector<128xf32> to vector<1x128xf32>
    %35 = vector.broadcast %8 : vector<1x1xf32> to vector<1x128xf32>
    %36 = arith.addf %34, %35 : vector<1x128xf32>
    %c0_16 = arith.constant 0 : index
    %c0_17 = arith.constant 0 : index
    %37 = vector.load %arg4[%c0_16, %c0_17] : memref<1x128xf32, #tpu.memory_space<vmem>>, vector<1x128xf32>
    tpu.vector_store %arg4[%c0_16, %c0_17], %36 {strides = array<i32>} : memref<1x128xf32, #tpu.memory_space<vmem>>, vector<1x128xf32>,
    return
  }
  func.func @transform_0(%arg0: i32) -> (i32, i32) {
    %c0_i32 = arith.constant 0 : i32
    %c0_i32_0 = arith.constant 0 : i32
    return %c0_i32, %arg0 : i32, i32
  }
  func.func @transform_1(%arg0: i32) -> (i32, i32) {
    %c0_i32 = arith.constant 0 : i32
    %c0_i32_0 = arith.constant 0 : i32
    %c0_i32_1 = arith.constant 0 : i32
    return %c0_i32, %c0_i32_0 : i32, i32
  }
  func.func @transform_2(%arg0: i32) -> (i32, i32) {
    %c0_i32 = arith.constant 0 : i32
    %c0_i32_0 = arith.constant 0 : i32
    %c0_i32_1 = arith.constant 0 : i32
    return %c0_i32, %c0_i32_0 : i32, i32
  }
  func.func @transform_3(%arg0: i32) -> (i32, i32) {
    %c0_i32 = arith.constant 0 : i32
    %c0_i32_0 = arith.constant 0 : i32
    return %c0_i32, %arg0 : i32, i32
  }
}

</mosaic_0001>

<bundles_post_ra>
// kernel: net_forward.1
= control target key start
LH: loop header
LB: loop body
LE: loop exit
PB: predicated region body
PF: predicated region fallthrough
CT: control target
= control target key end

     0   :  { %v378_v0 = vmov 1   ;;  %v379_v4 = vmov 0   ;;  %vm125_vm0 = vcmask 261120   ;;  %v51_v16 = vlaneseq  ;;  %s459_s1 = inlined_call_operand.vmem [shape: f32[64,64], index: 1, kind: input, shape index: {}]   ;;  %s460_s2 = inlined_call_operand.vmem [shape: f32[64,1], index: 2, kind: input, shape index: {}]   ;;  %s461_s0 = inlined_call_operand.vmem [shape: f32[2,128], index: 0, kind: input, shape index: {}]   ;;  %s462_s3 = inlined_call_operand.vmem [shape: f32[1,128], index: 3, kind: output, shape index: {}]  }
   0x1   :  { %360 = vset.pattern.permute.xlu0 %v378_v0  ;;  %358 = vset.pattern.permute.xlu1 %v378_v0  ;;  %v17_v1 = vld [vmem:[%s459_s1 + $0x10] sm:$0xff]  ;;  %v15_v2 = vld [vmem:[%s459_s1] sm:$0xff]  ;;  %v16_v3 = vld [vmem:[%s459_s1 + $0x8] sm:$0xff]  ;;  %v380_v58 = vmov 0.0|0.0   ;;  %vm381_vm1 = vmmov 0   ;;  %v382_v59 = vmov 0.0  }
   0x2   :  { %68 = vperm.xlu0 %360, %v17_v1   ;;  %60 = vperm.xlu1 %358, %v15_v2   ;;  %v18_v5 = vld [vmem:[%s459_s1 + $0x18] sm:$0xff]  ;;  %v24_v6 = vld [vmem:[%s460_s2 + $0x8] sm:$0xff]  ;;  %v23_v7 = vld [vmem:[%s460_s2] sm:$0xff]  ;;  %v52_v19 = vshrl.u32 %v51_v16, 7  ;;  %vm214_vm2 = vcmask 130048  }
   0x3   :  { %v27_v8 = vld [vmem:[%s460_s2 + $0x20] sm:$0xff]  ;;  %v25_v9 = vld [vmem:[%s460_s2 + $0x10] sm:$0xff]  ;;  %v26_v11 = vld [vmem:[%s460_s2 + $0x18] sm:$0xff]  ;;  %350 = vmatprep.subr.bf16.mxu1 %v380_v58  ;;  %339 = vmatprep.mubr.msk.f32.mxu1 %vm381_vm1, %v382_v59 }
   0x4   :  { %v29_v10 = vld [vmem:[%s460_s2 + $0x30] sm:$0xff]  ;;  %v30_v12 = vld [vmem:[%s460_s2 + $0x38] sm:$0x1]  ;;  %v28_v13 = vld [vmem:[%s460_s2 + $0x28] sm:$0xff]  ;;  %v53_v22 = vsub.s32 0, %v52_v19  ;;  %v77_v23 = vsub.s32 1, %v52_v19 }
   0x5   :  { %v22_v14 = vld [vmem:[%s459_s1 + $0x38] sm:$0xff]  ;;  %v19_v15 = vld [vmem:[%s459_s1 + $0x20] sm:$0xff]  ;;  %v20_v57 = vld [vmem:[%s459_s1 + $0x28] sm:$0xff] }
   0x6   :  { %361 = vset.pattern.permute.xlu0 %v379_v4  ;;  %64 = vperm.xlu1 %358, %v16_v3   ;;  %v14_v24 = vld [vmem:[%s461_s0] sm:$0x3] }
   0x7   :  { %33 = vperm.xlu0 %361, %v15_v2   ;;  %332 = vmatprep.mubr.msk.f32.mxu0 %vm125_vm0, %v19_v15  ;;  %v54_v27 = vrot.slane %v14_v24, %v53_v22  ;;  %v78_v28 = vrot.slane %v14_v24, %v77_v23 }
   0xa   :  { %359 = vset.pattern.permute.xlu1 %v379_v4 }
   0xb   :  { %38 = vperm.xlu0 %361, %v16_v3   ;;  %48 = vperm.xlu1 %359, %v18_v5  }
   0xf   :  { %43 = vperm.xlu0 %361, %v17_v1   ;;  %362 = vset.pattern.permute.xlu1 %v378_v0 }
  0x10   :  { %72 = vperm.xlu1 %362, %v18_v5   ;;  %v21_v5 = vld [vmem:[%s459_s1 + $0x30] sm:$0xff] }
  0x13   :  { %94 = vperm.xlu0 %361, %v24_v6  }
  0x14   :  { %363 = vset.pattern.permute.xlu1 %v379_v4 }
  0x15   :  { %89 = vperm.xlu1 %363, %v23_v7  }
  0x17   :  { %117 = vperm.xlu0 %361, %v27_v8  }
  0x19   :  { %99 = vperm.xlu1 %363, %v25_v9  }
  0x1b   :  { %211 = vperm.xlu0 %361, %v29_v10  }
  0x1d   :  { %104 = vperm.xlu1 %363, %v26_v11  }
  0x1f   :  { %303 = vperm.xlu0 %361, %v30_v12  }
  0x21   :  { %122 = vperm.xlu1 %363, %v28_v13  }
  0x25   :  { %291 = vperm.xlu1 %363, %v22_v14  }
  0x81   :  { %v61_v17 = vpop.permute.xlu1 %60  ;;  %v69_v18 = vpop.permute.xlu0 %68 }
  0x82   :  { %v79_v34 = vmul.f32 %v78_v28, %v61_v17  ;;  %v81_v42 = vmul.f32 %v78_v28, %v69_v18 }
  0x85   :  { %v65_v20 = vpop.permute.xlu1 %64 }
  0x86   :  { %v34_v21 = vpop.permute.xlu0 %33  ;;  %v80_v31 = vmul.f32 %v78_v28, %v65_v20 }
  0x87   :  { %v55_v32 = vmul.f32 %v54_v27, %v34_v21 }
  0x89   :  { %v83_v38 = vadd.f32 %v79_v34, %v55_v32 }
  0x8a   :  { %v39_v25 = vpop.permute.xlu0 %38  ;;  %v49_v26 = vpop.permute.xlu1 %48 }
  0x8b   :  { %v56_v29 = vmul.f32 %v54_v27, %v39_v25  ;;  %v58_v46 = vmul.f32 %v54_v27, %v49_v26 }
  0x8d   :  { %v84_v35 = vadd.f32 %v80_v31, %v56_v29 }
  0x8e   :  { %v44_v30 = vpop.permute.xlu0 %43 }
  0x8f   :  { %v73_v33 = vpop.permute.xlu1 %72  ;;  %v57_v39 = vmul.f32 %v54_v27, %v44_v30 }
  0x90   :  { %v82_v43 = vmul.f32 %v78_v28, %v73_v33 }
  0x91   :  { %v85_v45 = vadd.f32 %v81_v42, %v57_v39 }
  0x92   :  { %v95_v36 = vpop.permute.xlu0 %94  ;;  %v86_v48 = vadd.f32 %v82_v43, %v58_v46 }
  0x93   :  { %v108_v37 = vadd.f32 %v95_v36, %v84_v35 }
  0x94   :  { %v90_v40 = vpop.permute.xlu1 %89 }
  0x95   :  { %v107_v41 = vadd.f32 %v90_v40, %v83_v38  ;;  %364 = vtanh.f32 %v108_v37 }
  0x96   :  { %v118_v62 = vpop.permute.xlu0 %117 }
  0x97   :  { %366 = vtanh.f32 %v107_v41 }
  0x98   :  { %v100_v44 = vpop.permute.xlu1 %99 }
  0x99   :  { %v109_v47 = vadd.f32 %v100_v44, %v85_v45 }
  0x9a   :  { %v212_v6 = vpop.permute.xlu0 %211 }
  0x9b   :  { %368 = vtanh.f32 %v109_v47 }
  0x9c   :  { %v105_v49 = vpop.permute.xlu1 %104 }
  0x9d   :  { %v110_v50 = vadd.f32 %v105_v49, %v86_v48 }
  0x9e   :  { %v304_v19 = vpop.permute.xlu0 %303 }
  0x9f   :  { %370 = vtanh.f32 %v110_v50  ;;  %v365_v51 = vpop.eup %364 }
  0xa0   :  { %v123_v60 = vpop.permute.xlu1 %122 }
  0xa1   :  { %v367_v52 = vpop.eup %366 }
  0xa2   :  { %v342_v53 = vpack.c.bf16 %v365_v51, %v367_v52 }
  0xa4   :  { %343 = vmatprep.subr.bf16.mxu0 %v342_v53  ;;  %v292_v11 = vpop.permute.xlu1 %291 }
  0xa5   :  { %345 = vmatpush3.bf16.msra.mxu0 %v342_v53  ;;  %v369_v54 = vpop.eup %368 }
  0xa9   :  { %v371_v55 = vpop.eup %370 }
  0xaa   :  { %v346_v56 = vpack.c.bf16 %v371_v55, %v369_v54 }
  0xac   :  { %347 = vmatprep.subr.bf16.mxu0 %v346_v56 }
  0xad   :  { %349 = vmatpush3.bf16.msra.mxu0 %v346_v56 }
  0xb0   :  { %333 = vmatmul.mubr.msk.f32.vlgmr.msra.gmra.mrb[0].mxu0 %vm125_vm0, %v20_v57 }
 0x183   :  { %v334_v61 = vpop.f32.mrb[0].mxu0 }
 0x184   :  { %v204_v63 = vadd.f32 %v334_v61, %v123_v60  ;;  %v198_v0 = vpop.f32.mrb[1].mxu0 }
 0x185   :  { %v199_v1 = vadd.f32 %v198_v0, %v118_v62 }
 0x186   :  { %372 = vtanh.f32 %v204_v63 }
 0x187   :  { %374 = vtanh.f32 %v199_v1 }
 0x190   :  { %v373_v2 = vpop.eup %372 }
 0x191   :  { %v375_v3 = vpop.eup %374 }
 0x192   :  { %v351_v4 = vpack.c.bf16 %v373_v2, %v375_v3 }
 0x194   :  { %352 = vmatpush3.bf16.msra.mxu1 %v351_v4 }
 0x197   :  { %340 = vmatmul.mubr.msk.f32.vlgmr.msra.gmra.mrb[0].mxu1 %vm214_vm2, %v21_v5 }
 0x26a   :  { %v284_v7 = vpop.f32.mrb[0].mxu1 }
 0x26b   :  { %v285_v8 = vadd.f32 %v284_v7, %v212_v6  ;;  %v341_v9 = vpop.f32.mrb[1].mxu1 }
 0x26d   :  { %376 = vtanh.f32 %v285_v8 }
 0x277   :  { %v377_v10 = vpop.eup %376 }
 0x278   :  { %v294_v12 = vmul.f32 %v377_v10, %v292_v11 }
 0x27a   :  { %v295_v13 = vrot.slane %v294_v12, 4 }
 0x27c   :  { %v296_v14 = vadd.f32 %v295_v13, %v294_v12 }
 0x27e   :  { %v297_v15 = vrot.slane %v296_v14, 2 }
 0x280   :  { %v298_v16 = vadd.f32 %v297_v15, %v296_v14 }
 0x282   :  { %v299_v17 = vrot.slane %v298_v16, 1 }
 0x284   :  { %v300_v18 = vadd.f32 %v299_v17, %v298_v16 }
 0x286   :  { %v306_v20 = vadd.f32 %v304_v19, %v300_v18 }
 0x288   :  { %307 = vst [vmem:[%s462_s3] sm:$0x1] %v306_v20 }

</bundles_post_ra>
